<compile_context>
chip_gen: v5e
topology: v5e:2x2
jax: 0.10.0
libtpu: 0.0.40
codegen_flags: <defaults>
</compile_context>

<pallas_src>
import functools

import jax
import jax.numpy as jnp
from jax import lax
from jax.experimental import pallas as pl
from jax.experimental.pallas import tpu as pltpu

BN_EPS = 1e-5
NEG_SLOPE = 0.2


def _round_up(x, m):
    return (x + m - 1) // m * m


def _d1d_kernel(x_ref, w_ref, g_ref, beta_ref, o_ref,
                sum_ref, sumsq_ref, scale_ref, shift_ref,
                *, n_valid, tile_n, need_mask):
    phase = pl.program_id(1)   # 0: accumulate batch stats, 1: normalize + act
    tile = pl.program_id(2)    # which N-tile

    # Linear (bias omitted: it cancels exactly under train-mode BatchNorm).
    # f32 accumulation on the MXU regardless of input dtype.
    y = jnp.dot(x_ref[...], w_ref[...], preferred_element_type=jnp.float32)

    @pl.when(jnp.logical_and(phase == 0, tile == 0))
    def _():
        sum_ref[...] = jnp.zeros_like(sum_ref)
        sumsq_ref[...] = jnp.zeros_like(sumsq_ref)

    @pl.when(phase == 0)
    def _():
        if need_mask:
            # The last N-tile overruns the batch; out-of-bounds rows contain
            # unspecified data, so select (NaN-safe) instead of multiplying.
            rows = tile * tile_n + lax.broadcasted_iota(jnp.int32, y.shape, 0)
            yv = jnp.where(rows < n_valid, y, 0.0)
        else:
            yv = y
        sum_ref[...] += jnp.sum(yv, axis=0, keepdims=True)
        sumsq_ref[...] += jnp.sum(yv * yv, axis=0, keepdims=True)

    @pl.when(phase == 1)
    def _():
        @pl.when(tile == 0)
        def _():
            # Note: E[y^2]-E[y]^2 in f32 can lose precision for offset-heavy
            # activations; acceptable here since the bias is dropped.
            inv_n = jnp.float32(1.0 / n_valid)
            mean = sum_ref[...] * inv_n
            var = jnp.maximum(sumsq_ref[...] * inv_n - mean * mean, 0.0)
            a = g_ref[...] * lax.rsqrt(var + jnp.float32(BN_EPS))  # EUP rsqrt
            scale_ref[...] = a
            shift_ref[...] = beta_ref[...] - mean * a
        z = y * scale_ref[...] + shift_ref[...]            # fused BN affine
        o_ref[...] = jnp.where(z > 0, z, NEG_SLOPE * z).astype(o_ref.dtype)


def _vmem_budget_bytes():
    """Generation-aware (tile working-set budget, requested scoped-VMEM limit)."""
    cap = 64 * 1024 * 1024                           # conservative default (v7x)
    try:
        cap = int(pltpu.get_tpu_info().vmem_capacity_bytes)
    except Exception:                                # query unavailable
        pass
    if cap >= 100 * 1024 * 1024:                     # v5e / v6e: 128 MiB VMEM
        return 48 * 1024 * 1024, 80 * 1024 * 1024
    return 28 * 1024 * 1024, 48 * 1024 * 1024        # v7x: 64 MiB VMEM


def _pick_tile_f(fp):
    for cand in (512, 384, 256, 128):
        if cand <= fp and fp % cand == 0:
            return cand
    return fp


def d1d_forward(x, w, b, gamma, beta, *, tile_n=1024, tile_f=None,
                cast_bf16=False, out_dtype=jnp.float32):
    """d1D forward.  x: (N, D); w: (D, F) (transposed nn.Linear weight);
    b/gamma/beta: (F,).  Returns (N, F) in `out_dtype`.

    `b` is accepted for interface parity with nn.Linear but is unused: a
    per-feature constant shift is exactly cancelled by train-mode BatchNorm.
    """
    del b  # cancels under BatchNorm (train mode)
    N, D = x.shape
    F = w.shape[1]

    # Feature tiling: lane-dense (multiple of 128) blocks; pad F up if needed.
    if tile_f is None:
        Fp = _round_up(F, 128)
        tile_f = _pick_tile_f(Fp)
    else:
        tile_f = max(128, _round_up(int(tile_f), 128))
        Fp = _round_up(F, tile_f)
    n_f = Fp // tile_f

    xb = 2 if cast_bf16 else 4
    ob = jnp.dtype(out_dtype).itemsize

    # Size the batch tile against a generation-aware VMEM budget.
    budget, vmem_limit = _vmem_budget_bytes()

    def _vmem_bytes(tn):
        return (2 * (tn * D * xb             # x block (double-buffered)
                     + D * tile_f * xb       # W block
                     + tn * tile_f * ob      # out block
                     + 2 * tile_f * 4)       # gamma / beta blocks
                + 4 * tile_f * 4)            # stats / affine scratch

    tile_n = _round_up(min(tile_n, _round_up(N, 8)), 8)
    while tile_n > 8 and _vmem_bytes(tile_n) > budget:
        tile_n = max(8, _round_up(tile_n // 2, 8))

    n_tiles = -(-N // tile_n)
    need_mask = (N % tile_n) != 0

    # Only the feature axis of the params is padded (cheap, D*F-sized); the
    # batch axis of x is handled by the in-kernel mask, not a jnp.pad copy.
    if Fp != F:
        w = jnp.pad(w, ((0, 0), (0, Fp - F)))
        gamma = jnp.pad(gamma, (0, Fp - F), constant_values=1.0)
        beta = jnp.pad(beta, (0, Fp - F))

    if cast_bf16:
        # Cast in the wrapper so HBM DMA and VMEM footprint of x / W halve.
        x = x.astype(jnp.bfloat16)
        w = w.astype(jnp.bfloat16)
    else:
        x = x.astype(jnp.float32)
        w = w.astype(jnp.float32)
    g2 = gamma.reshape(1, Fp).astype(jnp.float32)
    be2 = beta.reshape(1, Fp).astype(jnp.float32)

    kernel = functools.partial(_d1d_kernel, n_valid=N, tile_n=tile_n,
                               need_mask=need_mask)

    out = pl.pallas_call(
        kernel,
        out_shape=jax.ShapeDtypeStruct((N, Fp), out_dtype),
        grid_spec=pltpu.PrefetchScalarGridSpec(
            num_scalar_prefetch=0,
            grid=(n_f, 2, n_tiles),            # (F-tile, phase, N-tile)
            in_specs=[
                pl.BlockSpec((tile_n, D), lambda f, p, i: (i, 0)),    # x
                pl.BlockSpec((D, tile_f), lambda f, p, i: (0, f)),    # W
                pl.BlockSpec((1, tile_f), lambda f, p, i: (0, f)),    # gamma
                pl.BlockSpec((1, tile_f), lambda f, p, i: (0, f)),    # beta
            ],
            # Output parking: during phase 0 the window stays at block (0, f)
            # and is never written, so Pallas never flushes an untouched
            # buffer; phase 1 walks the N-tiles and overwrites block (0, f)
            # before its first flush.  (Exercised by the multi-tile test.)
            out_specs=pl.BlockSpec((tile_n, tile_f),
                                   lambda f, p, i: (i * p, f)),
            scratch_shapes=[pltpu.VMEM((1, tile_f), jnp.float32)] * 4,
        ),
        compiler_params=pltpu.CompilerParams(
            # F tiles are independent (per-feature stats) -> megacore-parallel
            # on v7x.  Phase and N-tile carry the stats scratch sequentially.
            dimension_semantics=("parallel", "arbitrary", "arbitrary"),
            vmem_limit_bytes=vmem_limit,
        ),
        cost_estimate=pl.CostEstimate(
            flops=int(2 * 2 * N * D * Fp + 6 * N * Fp),
            transcendentals=int(Fp),
            bytes_accessed=int(2 * N * D * xb + D * Fp * xb + N * Fp * ob
                               + 4 * Fp * 4),
        ),
    )(x, w, g2, be2)

    return out if Fp == F else out[:, :F]


def d1d_reference(x, w, b, gamma, beta):
    y = jnp.dot(x, w, precision=lax.Precision.HIGHEST) + b[None, :]
    mean = jnp.mean(y, axis=0, keepdims=True)
    var = jnp.mean((y - mean) ** 2, axis=0, keepdims=True)  # biased (train)
    y_hat = (y - mean) / jnp.sqrt(var + BN_EPS)
    z = y_hat * gamma[None, :] + beta[None, :]
    return jnp.where(z > 0, z, NEG_SLOPE * z)


if __name__ == "__main__":
    key = jax.random.PRNGKey(0)
    k1, k2, k3, k4, k5, k6 = jax.random.split(key, 6)

    # --- Test 1: module-consistent small shapes (batch=16, input_dims=32,
    # filters=64), PyTorch-default BatchNorm affine params.
    N, D, F_ = 16, 32, 64
    bound = 1.0 / (D ** 0.5)
    x = jax.random.normal(k1, (N, D), dtype=jnp.float32)
    w = jax.random.uniform(k2, (D, F_), minval=-bound, maxval=bound,
                           dtype=jnp.float32)
    b = jax.random.uniform(k3, (F_,), minval=-bound, maxval=bound,
                           dtype=jnp.float32)
    gamma = jnp.ones((F_,), jnp.float32)    # BatchNorm1d default weight
    beta = jnp.zeros((F_,), jnp.float32)    # BatchNorm1d default bias

    out = jax.block_until_ready(d1d_forward(x, w, b, gamma, beta))
    ref = d1d_reference(x, w, b, gamma, beta)
    assert out.shape == (N, F_)
    assert jnp.allclose(out, ref, atol=1e-4, rtol=1e-4), "test 1 mismatch"

    # --- Test 2: ragged batch + multiple N-tiles + multiple F-tiles,
    # exercising the masked phase-0 path, feature-axis tiling, the feature-pad
    # slice, and the output-parking index map across tile boundaries.
    N2, D2, F2 = 40, 32, 192
    bound2 = 1.0 / (D2 ** 0.5)
    x2 = jax.random.normal(k4, (N2, D2), dtype=jnp.float32)
    w2 = jax.random.uniform(k5, (D2, F2), minval=-bound2, maxval=bound2,
                            dtype=jnp.float32)
    b2 = jnp.zeros((F2,), jnp.float32)
    g2 = 1.0 + 0.1 * jax.random.normal(k6, (F2,), dtype=jnp.float32)
    be2 = 0.1 * jnp.arange(F2, dtype=jnp.float32) / F2

    out2 = jax.block_until_ready(
        d1d_forward(x2, w2, b2, g2, be2, tile_n=16, tile_f=128))
    ref2 = d1d_reference(x2, w2, b2, g2, be2)
    assert out2.shape == (N2, F2)
    assert jnp.allclose(out2, ref2, atol=1e-4, rtol=1e-4), "test 2 mismatch"

    print("KERNEL_OK")
</pallas_src>

<mosaic_0001>
module attributes {stable_mosaic.version = 11 : i64} {
  func.func @_d1d_kernel(%arg0: i32, %arg1: i32, %arg2: i32, %arg3: memref<16x32xf32, #tpu.memory_space<vmem>>, %arg4: memref<32x128xf32, #tpu.memory_space<vmem>>, %arg5: memref<1x128xf32, #tpu.memory_space<vmem>>, %arg6: memref<1x128xf32, #tpu.memory_space<vmem>>, %arg7: memref<16x128xf32, #tpu.memory_space<vmem>>, %arg8: memref<1x128xf32, #tpu.memory_space<vmem>>, %arg9: memref<1x128xf32, #tpu.memory_space<vmem>>, %arg10: memref<1x128xf32, #tpu.memory_space<vmem>>, %arg11: memref<1x128xf32, #tpu.memory_space<vmem>>) attributes {dimension_semantics = [#tpu.dimension_semantics<parallel>, #tpu.dimension_semantics<arbitrary>, #tpu.dimension_semantics<arbitrary>], iteration_bounds = array<i64: 1, 2, 1>, scalar_prefetch = 0 : i64, scratch_operands = 4 : i64, tpu.core_type = #tpu.core_type<tc>, window_params = [{transform_indices = @transform_0, window_bounds = array<i64: 16, 32>}, {transform_indices = @transform_1, window_bounds = array<i64: 32, 128>}, {transform_indices = @transform_2, window_bounds = array<i64: 1, 128>}, {transform_indices = @transform_3, window_bounds = array<i64: 1, 128>}, {transform_indices = @transform_4, window_bounds = array<i64: 16, 128>}]} {
    %c0 = arith.constant 0 : index
    %c0_0 = arith.constant 0 : index
    %0 = vector.load %arg3[%c0, %c0_0] : memref<16x32xf32, #tpu.memory_space<vmem>>, vector<16x32xf32>
    %c0_1 = arith.constant 0 : index
    %c0_2 = arith.constant 0 : index
    %1 = vector.load %arg4[%c0_1, %c0_2] : memref<32x128xf32, #tpu.memory_space<vmem>>, vector<32x128xf32>
    %cst = arith.constant dense<0.000000e+00> : vector<16x128xf32>
    %2 = tpu.matmul %0, %1, %cst {dimension_numbers = #tpu.dot_dimension_numbers<[1], [0], [0], [1], [0, 0, 1, 1], [], []>} : vector<16x32xf32>, vector<32x128xf32>, vector<16x128xf32> -> vector<16x128xf32>
    %c0_i32 = arith.constant 0 : i32
    %3 = arith.cmpi eq, %arg1, %c0_i32 : i32
    %c0_i32_3 = arith.constant 0 : i32
    %4 = arith.cmpi eq, %arg2, %c0_i32_3 : i32
    %5 = arith.andi %3, %4 : i1
    %6 = arith.extui %5 : i1 to i32
    %c0_i32_4 = arith.constant 0 : i32
    %7 = arith.cmpi ne, %6, %c0_i32_4 : i32
    scf.if %7 {
      %cst_8 = arith.constant 0.000000e+00 : f32
      %14 = vector.broadcast %cst_8 : f32 to vector<1x128xf32>
      %c0_9 = arith.constant 0 : index
      %c0_10 = arith.constant 0 : index
      %15 = vector.load %arg8[%c0_9, %c0_10] : memref<1x128xf32, #tpu.memory_space<vmem>>, vector<1x128xf32>
      tpu.vector_store %arg8[%c0_9, %c0_10], %14 {strides = array<i32>} : memref<1x128xf32, #tpu.memory_space<vmem>>, vector<1x128xf32>,
      %cst_11 = arith.constant 0.000000e+00 : f32
      %16 = vector.broadcast %cst_11 : f32 to vector<1x128xf32>
      %c0_12 = arith.constant 0 : index
      %c0_13 = arith.constant 0 : index
      %17 = vector.load %arg9[%c0_12, %c0_13] : memref<1x128xf32, #tpu.memory_space<vmem>>, vector<1x128xf32>
      tpu.vector_store %arg9[%c0_12, %c0_13], %16 {strides = array<i32>} : memref<1x128xf32, #tpu.memory_space<vmem>>, vector<1x128xf32>,
    } else {
    }
    %c0_i32_5 = arith.constant 0 : i32
    %8 = arith.cmpi eq, %arg1, %c0_i32_5 : i32
    %9 = arith.extui %8 : i1 to i32
    %c0_i32_6 = arith.constant 0 : i32
    %10 = arith.cmpi ne, %9, %c0_i32_6 : i32
    scf.if %10 {
      %c0_8 = arith.constant 0 : index
      %c0_9 = arith.constant 0 : index
      %14 = vector.load %arg8[%c0_8, %c0_9] : memref<1x128xf32, #tpu.memory_space<vmem>>, vector<1x128xf32>
      %cst_10 = arith.constant dense<0.000000e+00> : vector<128xf32>
      %15 = vector.multi_reduction <add>, %2, %cst_10 [0] : vector<16x128xf32> to vector<128xf32>
      %16 = vector.shape_cast %15 : vector<128xf32> to vector<1x128xf32>
      %17 = arith.addf %14, %16 : vector<1x128xf32>
      %c0_11 = arith.constant 0 : index
      %c0_12 = arith.constant 0 : index
      %18 = vector.load %arg8[%c0_11, %c0_12] : memref<1x128xf32, #tpu.memory_space<vmem>>, vector<1x128xf32>
      tpu.vector_store %arg8[%c0_11, %c0_12], %17 {strides = array<i32>} : memref<1x128xf32, #tpu.memory_space<vmem>>, vector<1x128xf32>,
      %c0_13 = arith.constant 0 : index
      %c0_14 = arith.constant 0 : index
      %19 = vector.load %arg9[%c0_13, %c0_14] : memref<1x128xf32, #tpu.memory_space<vmem>>, vector<1x128xf32>
      %20 = arith.mulf %2, %2 : vector<16x128xf32>
      %cst_15 = arith.constant dense<0.000000e+00> : vector<128xf32>
      %21 = vector.multi_reduction <add>, %20, %cst_15 [0] : vector<16x128xf32> to vector<128xf32>
      %22 = vector.shape_cast %21 : vector<128xf32> to vector<1x128xf32>
      %23 = arith.addf %19, %22 : vector<1x128xf32>
      %c0_16 = arith.constant 0 : index
      %c0_17 = arith.constant 0 : index
      %24 = vector.load %arg9[%c0_16, %c0_17] : memref<1x128xf32, #tpu.memory_space<vmem>>, vector<1x128xf32>
      tpu.vector_store %arg9[%c0_16, %c0_17], %23 {strides = array<i32>} : memref<1x128xf32, #tpu.memory_space<vmem>>, vector<1x128xf32>,
    } else {
    }
    %c1_i32 = arith.constant 1 : i32
    %11 = arith.cmpi eq, %arg1, %c1_i32 : i32
    %12 = arith.extui %11 : i1 to i32
    %c0_i32_7 = arith.constant 0 : i32
    %13 = arith.cmpi ne, %12, %c0_i32_7 : i32
    scf.if %13 {
      %c0_i32_8 = arith.constant 0 : i32
      %14 = arith.cmpi eq, %arg2, %c0_i32_8 : i32
      %15 = arith.extui %14 : i1 to i32
      %c0_i32_9 = arith.constant 0 : i32
      %16 = arith.cmpi ne, %15, %c0_i32_9 : i32
      scf.if %16 {
        %c0_18 = arith.constant 0 : index
        %c0_19 = arith.constant 0 : index
        %29 = vector.load %arg8[%c0_18, %c0_19] : memref<1x128xf32, #tpu.memory_space<vmem>>, vector<1x128xf32>
        %cst_20 = arith.constant 6.250000e-02 : f32
        %30 = vector.broadcast %cst_20 : f32 to vector<1x128xf32>
        %31 = arith.mulf %29, %30 : vector<1x128xf32>
        %c0_21 = arith.constant 0 : index
        %c0_22 = arith.constant 0 : index
        %32 = vector.load %arg9[%c0_21, %c0_22] : memref<1x128xf32, #tpu.memory_space<vmem>>, vector<1x128xf32>
        %cst_23 = arith.constant 6.250000e-02 : f32
        %33 = vector.broadcast %cst_23 : f32 to vector<1x128xf32>
        %34 = arith.mulf %32, %33 : vector<1x128xf32>
        %35 = arith.mulf %31, %31 : vector<1x128xf32>
        %36 = arith.subf %34, %35 : vector<1x128xf32>
        %cst_24 = arith.constant 0.000000e+00 : f32
        %37 = vector.broadcast %cst_24 : f32 to vector<1x128xf32>
        %38 = arith.maximumf %36, %37 : vector<1x128xf32>
        %c0_25 = arith.constant 0 : index
        %c0_26 = arith.constant 0 : index
        %39 = vector.load %arg5[%c0_25, %c0_26] : memref<1x128xf32, #tpu.memory_space<vmem>>, vector<1x128xf32>
        %cst_27 = arith.constant 9.99999974E-6 : f32
        %40 = vector.broadcast %cst_27 : f32 to vector<1x128xf32>
        %41 = arith.addf %38, %40 : vector<1x128xf32>
        %42 = math.rsqrt %41 : vector<1x128xf32>
        %43 = arith.mulf %39, %42 : vector<1x128xf32>
        %c0_28 = arith.constant 0 : index
        %c0_29 = arith.constant 0 : index
        %44 = vector.load %arg10[%c0_28, %c0_29] : memref<1x128xf32, #tpu.memory_space<vmem>>, vector<1x128xf32>
        tpu.vector_store %arg10[%c0_28, %c0_29], %43 {strides = array<i32>} : memref<1x128xf32, #tpu.memory_space<vmem>>, vector<1x128xf32>,
        %c0_30 = arith.constant 0 : index
        %c0_31 = arith.constant 0 : index
        %45 = vector.load %arg6[%c0_30, %c0_31] : memref<1x128xf32, #tpu.memory_space<vmem>>, vector<1x128xf32>
        %46 = arith.mulf %31, %43 : vector<1x128xf32>
        %47 = arith.subf %45, %46 : vector<1x128xf32>
        %c0_32 = arith.constant 0 : index
        %c0_33 = arith.constant 0 : index
        %48 = vector.load %arg11[%c0_32, %c0_33] : memref<1x128xf32, #tpu.memory_space<vmem>>, vector<1x128xf32>
        tpu.vector_store %arg11[%c0_32, %c0_33], %47 {strides = array<i32>} : memref<1x128xf32, #tpu.memory_space<vmem>>, vector<1x128xf32>,
      } else {
      }
      %c0_10 = arith.constant 0 : index
      %c0_11 = arith.constant 0 : index
      %17 = vector.load %arg10[%c0_10, %c0_11] : memref<1x128xf32, #tpu.memory_space<vmem>>, vector<1x128xf32>
      %18 = vector.broadcast %17 : vector<1x128xf32> to vector<16x128xf32>
      %19 = arith.mulf %2, %18 : vector<16x128xf32>
      %c0_12 = arith.constant 0 : index
      %c0_13 = arith.constant 0 : index
      %20 = vector.load %arg11[%c0_12, %c0_13] : memref<1x128xf32, #tpu.memory_space<vmem>>, vector<1x128xf32>
      %21 = vector.broadcast %20 : vector<1x128xf32> to vector<16x128xf32>
      %22 = arith.addf %19, %21 : vector<16x128xf32>
      %cst_14 = arith.constant 0.000000e+00 : f32
      %23 = vector.broadcast %cst_14 : f32 to vector<16x128xf32>
      %24 = arith.cmpf ogt, %22, %23 : vector<16x128xf32>
      %cst_15 = arith.constant 2.000000e-01 : f32
      %25 = vector.broadcast %cst_15 : f32 to vector<16x128xf32>
      %26 = arith.mulf %25, %22 : vector<16x128xf32>
      %27 = arith.select %24, %22, %26 : vector<16x128xi1>, vector<16x128xf32>
      %c0_16 = arith.constant 0 : index
      %c0_17 = arith.constant 0 : index
      %28 = vector.load %arg7[%c0_16, %c0_17] : memref<16x128xf32, #tpu.memory_space<vmem>>, vector<16x128xf32>
      tpu.vector_store %arg7[%c0_16, %c0_17], %27 {strides = array<i32>} : memref<16x128xf32, #tpu.memory_space<vmem>>, vector<16x128xf32>,
    } else {
    }
    return
  }
  func.func @transform_0(%arg0: i32, %arg1: i32, %arg2: i32) -> (i32, i32) {
    %c0_i32 = arith.constant 0 : i32
    %c0_i32_0 = arith.constant 0 : i32
    return %arg2, %c0_i32 : i32, i32
  }
  func.func @transform_1(%arg0: i32, %arg1: i32, %arg2: i32) -> (i32, i32) {
    %c0_i32 = arith.constant 0 : i32
    %c0_i32_0 = arith.constant 0 : i32
    return %c0_i32, %arg0 : i32, i32
  }
  func.func @transform_2(%arg0: i32, %arg1: i32, %arg2: i32) -> (i32, i32) {
    %c0_i32 = arith.constant 0 : i32
    %c0_i32_0 = arith.constant 0 : i32
    return %c0_i32, %arg0 : i32, i32
  }
  func.func @transform_3(%arg0: i32, %arg1: i32, %arg2: i32) -> (i32, i32) {
    %c0_i32 = arith.constant 0 : i32
    %c0_i32_0 = arith.constant 0 : i32
    return %c0_i32, %arg0 : i32, i32
  }
  func.func @transform_4(%arg0: i32, %arg1: i32, %arg2: i32) -> (i32, i32) {
    %0 = arith.muli %arg2, %arg1 : i32
    %c0_i32 = arith.constant 0 : i32
    return %0, %arg0 : i32, i32
  }
}

</mosaic_0001>

<bundles_post_ra>
// kernel: tpu_custom_call.1
= control target key start
LH: loop header
LB: loop body
LE: loop exit
PB: predicated region body
PF: predicated region fallthrough
CT: control target
= control target key end

     0   :  { %9 = vsyncpa [#allocation7], 0  ;;  %s856_s0 = inlined_call_operand.hbm [shape: f32[16,32], index: 0, kind: input, shape index: {}]   ;;  %s857_s1 = inlined_call_operand.hbm [shape: f32[32,128], index: 1, kind: input, shape index: {}]   ;;  %s858_s2 = inlined_call_operand.vmem [shape: f32[1,128], index: 2, kind: input, shape index: {}]   ;;  %s859_s3 = inlined_call_operand.vmem [shape: f32[1,128], index: 3, kind: input, shape index: {}]   ;;  %s860_s4 = inlined_call_operand.hbm [shape: f32[16,128], index: 4, kind: output, shape index: {}]  }
   0x1   :  { %10 = vsyncpa [#allocation10], 0 }
   0x2   :  { %11 = vsyncpa [#allocation8], 0 }
   0x3   :  { %13 = vsyncpa [#allocation8 + $0x1], 0  ;;  %s778_s15 = smov 0   ;;  %s780_s16 = smov 0  }
   0x4   :  { %s782_s17 = smov 0  }
   0x5 LB: > { %s531_s18 = sadd.s32 4294967295, %s743_s17   ;;  %s532_s19 = sadd.s32 4294967294, %s743_s17   ;;  %s743_s17 = sphi %s782_s17, %s19_s17   ;;  %s739_s16 = sphi %s780_s16, %s864_s16   ;;  %s735_s15 = sphi %s778_s15, %s863_s15  }
   0x6   : > { %s34_s20 = sadd.s32 1, %s739_s16  ;;  %p533_p0 = scmp.ge.s32.totalorder %s743_s17, 1 }
   0x7   : > { %p36_p1 = scmp.ge.s32.totalorder %s34_s20, 2  ;;  %p177_p2 = scmp.lt.s32.totalorder %s743_s17, 3 }
   0x8   : > { %p800_p3 = scmp.eq.s32.totalorder %s531_s18, 0  ;;  %s191_s25 = sshll.u32 %s856_s0, 4  ;;  %s192_s25 = int_to_ptr.hbm [resolvable:$true] %s191_s25 }
   0x9   : > { %s866_s20 = smov (%p36_p1, %s34_s20), 0  ;;  %p806_p4 = pnand %p533_p0, %p177_p2 }
   0xa   : > { %s745_s26 = smov [#allocation6]   ;;  %s207_s30 = sshll.u32 %s857_s1, 4  ;;  %s208_s30 = int_to_ptr.hbm [resolvable:$true] %s207_s30 }
   0xb   : > { %p567_p5 = pneg %p806_p4  ;;  %s193_s27 = sshll.u32 %s745_s26, 4  ;;  %s194_s27 = int_to_ptr.vmem [resolvable:$true] %s193_s27 }
   0xc   : > { %s746_s5 = smov 128   ;;  %s747_s6 = smov 8  }
   0xd   : > { %p568_p6 = pnand %p800_p3, %p567_p5  ;;  %s748_s7 = smov [#allocation9]  }
   0xe   : > { %s209_s8 = sshll.u32 %s748_s7, 4  ;;  %237 = sbr.rel (%p806_p4) target bundleno = 243 (0xf3), region = 36  ;;  %s210_s8 = int_to_ptr.vmem [resolvable:$true] %s209_s8 }
   0xf   : > { %570 = dma.hbm_to_vmem [thread:$0]  (!%p568_p6), %s192_s25, 256, %s194_s27, [#allocation7], %s746_s5, %s746_s5, %s747_s6  }
  0x10   : > { %573 = dma.hbm_to_vmem [thread:$0]  (!%p568_p6), %s208_s30, 512, %s210_s8, [#allocation10], %s746_s5, %s746_s5, %s747_s6  }
  0x13   : > { %722 = dma.done.wait (%p800_p3), [#allocation7], 256  }
  0x14   : > { %724 = vsyncadd (%p800_p3), [#allocation7], 4294967040 }
  0x15   : > { %726 = dma.done.wait (%p800_p3), [#allocation10], 512  }
  0x16   : > { %728 = vsyncadd (%p800_p3), [#allocation10], 4294966784  ;;  %v284_v0 = vld [vmem:[#allocation9 + $0x18] sm:$0xff]  ;;  %v283_v1 = vld [vmem:[#allocation9 + $0x10] sm:$0xff]  ;;  %vm285_vm0 = vcmask 261120   ;;  %p315_p7 = scmp.eq.s32.totalorder %s735_s15, 0 }
  0x17   : > { %304 = vmatpush.msra.mxu0 %v284_v0  ;;  %551 = vmatpush.msra.mxu1 %v284_v0  ;;  %v282_v2 = vld [vmem:[#allocation9 + $0x8] sm:$0xff]  ;;  %v281_v3 = vld [vmem:[#allocation9] sm:$0xff]  ;;  %v279_v4 = vld [vmem:[#allocation6] sm:$0xff]  ;;  %v749_v8 = vmov (%p315_p7), 0.0  }
  0x18   : > { %v280_v5 = vld [vmem:[#allocation6 + $0x8] sm:$0xff]  ;;  %321 = vst [vmem:[#allocation2] sm:$0x1] (%p315_p7), %v749_v8 }
  0x19   : > { %305 = vmatpush.msra.mxu0 %v283_v1  ;;  %552 = vmatpush.msra.mxu1 %v283_v1  ;;  %322 = vst [vmem:[#allocation3] sm:$0x1] (%p315_p7), %v749_v8 }
  0x1b   : > { %306 = vmatpush.msra.mxu0 %v282_v2  ;;  %553 = vmatpush.msra.mxu1 %v282_v2 }
  0x1d   : > { %307 = vmatpush.msra.mxu0 %v281_v3  ;;  %554 = vmatpush.msra.mxu1 %v281_v3 }
  0x1e   : > { %541 = vmatmul.msk.f32.vlgmr.msra.gmra.mxu0 %vm285_vm0, %v279_v4  ;;  %542 = vmatmul.msk.f32.vlgmr.msra.gmra.mxu1 %vm285_vm0, %v280_v5 }
  0x97   : > { %320 = sbr.rel (!%p315_p7) target bundleno = 156 (0x9c), region = 48 }
  0x9b   : > { %v309_v6 = vpop.f32.mrf.mxu0  ;;  %v312_v7 = vpop.f32.mrf.mxu1 }
  0x9c PF: > { %p544_p8 = scmp.ne.s32.totalorder %s735_s15, 0 }
  0x9e   : > { %325 = sbr.rel (%p544_p8) target bundleno = 182 (0xb6), region = 52 }
  0xa3   : > { %v327_v9 = vadd.f32 %v312_v7, %v309_v6  ;;  %v337_v10 = vmul.f32 %v309_v6, %v309_v6  ;;  %v338_v11 = vmul.f32 %v312_v7, %v312_v7  ;;  %v326_v22 = vld [vmem:[#allocation2] sm:$0x1]  ;;  %v336_v25 = vld [vmem:[#allocation3] sm:$0x1] }
  0xa5   : > { %v328_v12 = vrot.slane %v327_v9, 4  ;;  %v339_v13 = vadd.f32 %v338_v11, %v337_v10 }
  0xa7   : > { %v329_v14 = vadd.f32 %v328_v12, %v327_v9  ;;  %v340_v15 = vrot.slane %v339_v13, 4 }
  0xa9   : > { %v330_v16 = vrot.slane %v329_v14, 2  ;;  %v341_v17 = vadd.f32 %v340_v15, %v339_v13 }
  0xab   : > { %v331_v18 = vadd.f32 %v330_v16, %v329_v14  ;;  %v342_v19 = vrot.slane %v341_v17, 2 }
  0xad   : > { %v332_v20 = vrot.slane %v331_v18, 1  ;;  %v343_v21 = vadd.f32 %v342_v19, %v341_v17 }
  0xaf   : > { %v333_v23 = vadd.f32 %v332_v20, %v331_v18  ;;  %v344_v24 = vrot.slane %v343_v21, 1 }
  0xb1   : > { %v334_v26 = vadd.f32 %v333_v23, %v326_v22  ;;  %v345_v27 = vadd.f32 %v344_v24, %v343_v21 }
  0xb3   : > { %335 = vst [vmem:[#allocation2] sm:$0x1] %v334_v26  ;;  %v346_v28 = vadd.f32 %v345_v27, %v336_v25 }
  0xb5   : > { %347 = vst [vmem:[#allocation3] sm:$0x1] %v346_v28 }
  0xb6 PF: > { %p545_p9 = scmp.ne.s32.totalorder %s735_s15, 1 }
  0xb8   : > { %351 = sbr.rel (%p545_p9) target bundleno = 239 (0xef), region = 56 }
  0xbd   : > { %v355_v29 = vld [vmem:[#allocation2] sm:$0x1]  ;;  %v357_v30 = vld [vmem:[#allocation3] sm:$0x1] }
  0xbe   : > { %v356_v31 = vmul.f32 0.0625, %v355_v29  ;;  %v358_v32 = vmul.f32 0.0625, %v357_v30  ;;  %v362_v42 = vld [vmem:[%s858_s2] sm:$0x1] }
  0xbf   : > { %v376_v46 = vld [vmem:[%s859_s3] sm:$0x1] }
  0xc0   : > { %v359_v33 = vmul.f32 %v356_v31, %v356_v31 }
  0xc2   : > { %v360_v34 = vsub.f32 %v358_v32, %v359_v33 }
  0xc4   : > { %v361_v35 = vmax.f32 %v360_v34, 0.0 }
  0xc6   : > { %v363_v36 = vadd.f32 1e-05, %v361_v35 }
  0xc8   : > { %619 = vrsqrt.f32 %v363_v36  ;;  %vm370_vm1 = vweird.f32 %v363_v36 }
  0xce   : > { %v620_v37 = vpop.eup %619 }
  0xcf   : > { %v365_v38 = vmul.f32 %v620_v37, %v363_v36  ;;  %vm371_vm2 = vweird.f32 %v620_v37 }
  0xd0   : > { %vm372_vm3 = vmor %vm370_vm1, %vm371_vm2 }
  0xd1   : > { %v366_v39 = vmul.f32 %v620_v37, %v365_v38 }
  0xd3   : > { %v367_v40 = vmul.f32 0.5, %v366_v39 }
  0xd5   : > { %v368_v41 = vsub.f32 1.5, %v367_v40 }
  0xd7   : > { %v369_v43 = vmul.f32 %v620_v37, %v368_v41 }
  0xd9   : > { %v373_v44 = vsel %vm372_vm3, %v620_v37, %v369_v43 }
  0xda   : > { %v374_v45 = vmul.f32 %v373_v44, %v362_v42 }
  0xdc   : > { %375 = vst [vmem:[#allocation4] sm:$0x1] %v374_v45  ;;  %v377_v47 = vmul.f32 %v374_v45, %v356_v31 }
  0xde   : > { %v378_v48 = vsub.f32 %v376_v46, %v377_v47 }
  0xe0   : > { %379 = vst [vmem:[#allocation5] sm:$0x1] %v378_v48 }
  0xe3   : > { %v617_v49 = vld [vmem:[#allocation4] ss:$0 sm:$0xff] }
  0xe4   : > { %v384_v50 = vmul.f32 %v617_v49, %v309_v6  ;;  %v385_v51 = vmul.f32 %v617_v49, %v312_v7 }
  0xe7   : > { %v618_v52 = vld [vmem:[#allocation5] ss:$0 sm:$0xff] }
  0xe8   : > { %v390_v53 = vadd.f32 %v618_v52, %v384_v50  ;;  %v391_v54 = vadd.f32 %v618_v52, %v385_v51 }
  0xea   : > { %vm392_vm4 = vcmp.gt.f32.partialorder %v390_v53, 0.0  ;;  %v394_v55 = vmul.f32 0.2, %v390_v53  ;;  %vm393_vm5 = vcmp.gt.f32.partialorder %v391_v54, 0.0  ;;  %v395_v56 = vmul.f32 0.2, %v391_v54 }
  0xec   : > { %v396_v57 = vsel %vm392_vm4, %v390_v53, %v394_v55  ;;  %v397_v58 = vsel %vm393_vm5, %v391_v54, %v395_v56 }
  0xed   : > { %398 = vst [vmem:[#allocation11] sm:$0xff] %v396_v57 }
  0xee   : > { %399 = vst [vmem:[#allocation11 + $0x8] sm:$0xff] %v397_v58 }
  0xef PF: > { %p582_p10 = scmp.eq.s32.totalorder %s531_s18, 1  ;;  %s417_s15 = sshll.u32 %s860_s4, 4  ;;  %s418_s15 = int_to_ptr.hbm [resolvable:$true] %s417_s15 }
  0xf0   : > { %s750_s21 = smov [#allocation11]   ;;  %s751_s23 = smov 128  }
  0xf1   : > { %s415_s22 = sshll.u32 %s750_s21, 4  ;;  %s752_s24 = smov 8   ;;  %s416_s22 = int_to_ptr.vmem [resolvable:$true] %s415_s22 }
  0xf2   : > { %564 = dma.vmem_to_hbm [thread:$0]  (%p582_p10), %s416_s22, 256, %s418_s15, [#allocation8], %s751_s23, %s751_s23, %s752_s24  }
  0xf3 PF: > { %p583_p11 = scmp.ge.s32.totalorder %s743_s17, 2  ;;  %p584_p12 = scmp.eq.s32.totalorder %s532_s19, 1 }
  0xf5   : > { %p575_p13 = pnand %p584_p12, %p583_p11 }
  0xf7   : > { %p576_p0 = pneg %p575_p13 }
  0xf9   : > { %730 = dma.done.wait (%p576_p0), [#allocation8], 256  }
  0xfa   : > { %732 = vsyncadd (%p576_p0), [#allocation8], 4294967040  ;;  %s19_s17 = sadd.s32 1, %s743_s17   ;;  %s863_s15 = smov %s739_s16 }
  0xfb   : > { %p16_p1 = scmp.ge.s32.totalorder %s19_s17, 4   ;;  %s864_s16 = smov %s866_s20 }
  0xfd   :  { %18 = sbr.rel (!%p16_p1) target bundleno = 5 (0x5), region = 101 }
 0x102   :  { %439 = vsyncpa [#allocation7], 1 }
 0x103   :  { %441 = vsyncpa [#allocation7 + $0x1], 1 }
 0x104   :  { %442 = vsyncpa [#allocation10], 1 }
 0x105   :  { %443 = vsyncpa [#allocation8], 1 }
 0x106   :  { %445 = vsyncpa [#allocation8 + $0x1], 1 }

</bundles_post_ra>
